<compile_context>
chip_gen: v7x
topology: tpu7x:2x2x1
jax: 0.10.0
libtpu: 0.0.40
codegen_flags: <defaults>
</compile_context>

<pallas_src>
import functools

import jax
import jax.numpy as jnp
from jax import lax
from jax.experimental import pallas as pl
from jax.experimental.pallas import tpu as pltpu

TEMPERATURE = 0.07
NORM_EPS = 1e-12          # matches torch.nn.functional.normalize default eps


def _contrastive_kernel(feat_ref, rlab_ref, rfeat_ref, out_ref, *, total_b):
    tb = feat_ref.shape[0]
    k = rfeat_ref.shape[1]

    feats = feat_ref[...]                    # (TB, D)    native dtype
    rlab_all = rlab_ref[...]                 # (TB, K+1)  int32; last col = anchor label
    rf = rfeat_ref[...]                      # (TB, K, D) native dtype

    rlabels = rlab_all[:, :k]                # (TB, K)
    anchor_lab = rlab_all[:, k:k + 1]        # (TB, 1)

    # Row-index validity for the ragged last tile (inputs are NOT padded; out-of-bounds
    # rows of the block contain unspecified values and must be masked by index).
    row = pl.program_id(0) * tb + lax.broadcasted_iota(jnp.int32, (tb, 1), 0)
    row_valid = row < total_b                # (TB, 1)

    # Single VPU pass over the loaded retrieval block: anchor·retrieval dot and
    # retrieval sum-of-squares, both accumulated in f32. No separate f32 copy of the
    # dominant (TB,K,D) block is materialized.
    prod = rf * feats[:, None, :]                                    # (TB, K, D)
    sim_un = jnp.sum(prod, axis=2, dtype=jnp.float32)                # (TB, K)
    rfeat_ss = jnp.sum(rf * rf, axis=2, dtype=jnp.float32)           # (TB, K)

    feats_f32 = feats.astype(jnp.float32)
    feat_ss = jnp.sum(feats_f32 * feats_f32, axis=1, keepdims=True)  # (TB, 1)

    # Normalization as rsqrt scales (EUP); fold 1/temperature into the anchor scale.
    # max(||x||, eps) == rsqrt-form with max(sumsq, eps^2) since sqrt is monotone.
    anchor_scale = lax.rsqrt(jnp.maximum(feat_ss, NORM_EPS * NORM_EPS)) * (1.0 / TEMPERATURE)
    r_scale = lax.rsqrt(jnp.maximum(rfeat_ss, NORM_EPS * NORM_EPS))
    logits = sim_un * (anchor_scale * r_scale)                       # (TB, K)

    # Masks (retrieved label == -1 -> invalid retrieval slot).
    valid_r = rlabels != -1
    positive = jnp.logical_and(rlabels == anchor_lab, valid_r)
    pos_f = positive.astype(jnp.float32)
    val_f = valid_r.astype(jnp.float32)

    has_positive = jnp.sum(pos_f, axis=1, keepdims=True) > 0.0       # (TB, 1)

    # Normalized sims lie in [-1, 1] so |logits| <= 1/temperature (~14.3) for valid
    # rows and exp stays well inside f32 range; garbage (ragged) rows are masked and
    # isfinite-checked below.
    exp_logits = jnp.exp(logits) * val_f                             # (TB, K)
    pos_exp_sum = jnp.sum(exp_logits * pos_f, axis=1, keepdims=True)  # (TB, 1)
    all_exp_sum = jnp.sum(exp_logits, axis=1, keepdims=True)          # (TB, 1)
    loss_anchor = -jnp.log(pos_exp_sum / (all_exp_sum + 1e-10) + 1e-10)

    valid = jnp.logical_and(
        row_valid, jnp.logical_and(has_positive, jnp.isfinite(loss_anchor)))

    tile_loss = jnp.sum(jnp.where(valid, loss_anchor, 0.0))           # scalar
    tile_count = jnp.sum(valid.astype(jnp.float32))                   # scalar

    # Lane-dense (1, 8, 128) partial slab: lane 0 = loss sum, lane 1 = valid count.
    lane = lax.broadcasted_iota(jnp.int32, (1, 8, 128), 2)
    out_ref[...] = jnp.where(lane == 0, tile_loss,
                             jnp.where(lane == 1, tile_count, 0.0))


def _round_up(x, m):
    return ((x + m - 1) // m) * m


def _pick_tile_b(B, K, D, itemsize):
    """Batch tile from a VMEM budget: ~4 MiB of retrieval data per grid step
    (~8 MiB double-buffered, safe under v5e's 16 MiB scoped default and v7x's
    64 MiB physical VMEM). Prefer >=2 grid steps so the 'parallel' batch axis
    can shard across both v7x TensorCores."""
    row_bytes = max(K * D * itemsize, 1)
    tb = max(8, ((4 << 20) // row_bytes // 8) * 8)
    if tb < B:
        return tb
    if B > 8:
        half = _round_up((B + 1) // 2, 8)
        if half < B:
            return half
    return B  # single tile; tb == B is allowed (block dim equals full extent)


@functools.partial(jax.jit, static_argnames=("tile_b",))
def simple_contrastive_loss(features, labels, retrieval_features,
                            retrieval_labels, *, tile_b=None):
    """features (B,D), labels (B,) int, retrieval_features (B,K,D),
    retrieval_labels (B,K) int -> scalar f32 loss."""
    B, D = features.shape
    _, K, D2 = retrieval_features.shape
    if D2 != D:
        # mirrors the dimension-mismatch early return of the torch module
        # TODO(synk): the torch warning print is not replicated.
        return jnp.float32(0.0)

    itemsize = jnp.dtype(features.dtype).itemsize
    tb = _pick_tile_b(B, K, D, itemsize) if tile_b is None else int(tile_b)
    if tb >= B:
        tb = B                        # one tile covering the whole batch
    elif tb % 8 != 0:
        tb = max(8, (tb // 8) * 8)    # sublane-aligned tiles otherwise
    num_tiles = (B + tb - 1) // tb    # last tile may be ragged; masked in-kernel

    # Anchor labels ride as the last lane column of the retrieval-label block so the
    # kernel has one (lane-padded) label stream instead of an extra width-1 one.
    rlab_aug = jnp.concatenate(
        [retrieval_labels.astype(jnp.int32),
         labels.reshape(B, 1).astype(jnp.int32)], axis=1)            # (B, K+1)

    kernel = functools.partial(_contrastive_kernel, total_b=B)

    partials = pl.pallas_call(
        kernel,
        out_shape=jax.ShapeDtypeStruct((num_tiles, 8, 128), jnp.float32),
        grid=(num_tiles,),
        in_specs=[
            pl.BlockSpec((tb, D), lambda i: (i, 0)),          # anchors (native dtype)
            pl.BlockSpec((tb, K + 1), lambda i: (i, 0)),      # retrieval + anchor labels
            pl.BlockSpec((tb, K, D), lambda i: (i, 0, 0)),    # retrieved features
        ],
        out_specs=pl.BlockSpec((1, 8, 128), lambda i: (i, 0, 0)),
        compiler_params=pltpu.CompilerParams(
            dimension_semantics=("parallel",),
            vmem_limit_bytes=32 * 1024 * 1024),
        cost_estimate=pl.CostEstimate(
            flops=4 * B * K * D + 8 * B * K,
            transcendentals=B * K + 4 * B,
            bytes_accessed=(B * K * D + B * D) * itemsize
                           + B * (K + 1) * 4 + num_tiles * 8 * 128 * 4),
    )(features, rlab_aug, retrieval_features)

    total_loss = jnp.sum(partials[:, 0, 0])
    valid_count = jnp.sum(partials[:, 0, 1])
    # max(count, 1) denominator so no inf/nan is ever formed (safe if differentiated).
    mean = total_loss / jnp.maximum(valid_count, 1.0)
    return jnp.where(valid_count > 0.0, mean, jnp.float32(0.0))


def _reference(features, labels, retrieval_features, retrieval_labels):
    """Pure-JAX reference replicating the torch loop semantics (vectorized)."""
    feats = features.astype(jnp.float32)
    rfeats = retrieval_features.astype(jnp.float32)
    labels = labels.astype(jnp.int32)
    rlabels = retrieval_labels.astype(jnp.int32)
    fn = feats / jnp.maximum(jnp.linalg.norm(feats, axis=1, keepdims=True), NORM_EPS)
    rn = rfeats / jnp.maximum(jnp.linalg.norm(rfeats, axis=2, keepdims=True), NORM_EPS)
    sim = jnp.einsum("bd,bkd->bk", fn, rn, precision=jax.lax.Precision.HIGHEST)
    logits = sim / TEMPERATURE
    valid_r = (rlabels != -1).astype(jnp.float32)
    pos = (rlabels == labels[:, None]).astype(jnp.float32) * valid_r
    has_pos = pos.sum(axis=1) > 0
    exp_l = jnp.exp(logits) * valid_r
    pos_sum = (exp_l * pos).sum(axis=1)
    all_sum = exp_l.sum(axis=1)
    loss = -jnp.log(pos_sum / (all_sum + 1e-10) + 1e-10)
    valid = has_pos & jnp.isfinite(loss)
    cnt = valid.sum()
    return jnp.where(cnt > 0, jnp.where(valid, loss, 0.0).sum() / jnp.maximum(cnt, 1), 0.0)


if __name__ == "__main__":
    key = jax.random.PRNGKey(0)
    k1, k2, k3, k4 = jax.random.split(key, 4)

    # B=12 deliberately exercises the ragged last tile (2 grid steps of tb=8).
    B, K, D = 12, 8, 32
    features = jax.random.normal(k1, (B, D), dtype=jnp.float32)
    labels = jax.random.randint(k2, (B,), 0, 3, dtype=jnp.int32)
    retrieval_features = jax.random.normal(k3, (B, K, D), dtype=jnp.float32)
    # include some -1 (invalid) retrieval labels
    retrieval_labels = jax.random.randint(k4, (B, K), -1, 3, dtype=jnp.int32)

    loss = simple_contrastive_loss(features, labels,
                                   retrieval_features, retrieval_labels)
    jax.block_until_ready(loss)

    ref = _reference(features, labels, retrieval_features, retrieval_labels)
    assert jnp.allclose(loss, ref, atol=1e-3, rtol=1e-3), (loss, ref)

    print("KERNEL_OK")
</pallas_src>

<mosaic_0001>
module attributes {stable_mosaic.version = 11 : i64} {
  func.func @_contrastive_kernel(%arg0: i32, %arg1: memref<8x32xf32, #tpu.memory_space<vmem>>, %arg2: memref<8x9xi32, #tpu.memory_space<vmem>>, %arg3: memref<8x8x32xf32, #tpu.memory_space<vmem>>, %arg4: memref<1x8x128xf32, #tpu.memory_space<vmem>>) attributes {dimension_semantics = [#tpu.dimension_semantics<parallel>], iteration_bounds = array<i64: 2>, scalar_prefetch = 0 : i64, scratch_operands = 0 : i64, tpu.core_type = #tpu.core_type<tc>, window_params = [{transform_indices = @transform_0, window_bounds = array<i64: 8, 32>}, {transform_indices = @transform_1, window_bounds = array<i64: 8, 9>}, {transform_indices = @transform_2, window_bounds = array<i64: 8, 8, 32>}, {transform_indices = @transform_3, window_bounds = array<i64: 1, 8, 128>}]} {
    %c0 = arith.constant 0 : index
    %c0_0 = arith.constant 0 : index
    %0 = vector.load %arg1[%c0, %c0_0] : memref<8x32xf32, #tpu.memory_space<vmem>>, vector<8x32xf32>
    %c0_1 = arith.constant 0 : index
    %c0_2 = arith.constant 0 : index
    %1 = vector.load %arg2[%c0_1, %c0_2] : memref<8x9xi32, #tpu.memory_space<vmem>>, vector<8x9xi32>
    %c0_3 = arith.constant 0 : index
    %c0_4 = arith.constant 0 : index
    %c0_5 = arith.constant 0 : index
    %2 = vector.load %arg3[%c0_3, %c0_4, %c0_5] : memref<8x8x32xf32, #tpu.memory_space<vmem>>, vector<8x8x32xf32>
    %3 = vector.extract_strided_slice %1 {offsets = [0, 0], sizes = [8, 8], strides = [1, 1]} : vector<8x9xi32> to vector<8x8xi32>
    %4 = vector.extract_strided_slice %1 {offsets = [0, 8], sizes = [8, 1], strides = [1, 1]} : vector<8x9xi32> to vector<8x1xi32>
    %c8_i32 = arith.constant 8 : i32
    %5 = arith.muli %arg0, %c8_i32 : i32
    %6 = tpu.iota {dimensions = array<i32: 0>} : vector<8x1xi32>
    %7 = vector.broadcast %5 : i32 to vector<8x1xi32>
    %8 = arith.addi %7, %6 : vector<8x1xi32>
    %c12_i32 = arith.constant 12 : i32
    %9 = vector.broadcast %c12_i32 : i32 to vector<8x1xi32>
    %10 = arith.cmpi slt, %8, %9 : vector<8x1xi32>
    %11 = vector.shape_cast %0 : vector<8x32xf32> to vector<8x1x32xf32>
    %12 = vector.broadcast %11 : vector<8x1x32xf32> to vector<8x8x32xf32>
    %13 = arith.mulf %2, %12 : vector<8x8x32xf32>
    %cst = arith.constant dense<0.000000e+00> : vector<8x8xf32>
    %14 = vector.multi_reduction <add>, %13, %cst [2] : vector<8x8x32xf32> to vector<8x8xf32>
    %15 = arith.mulf %2, %2 : vector<8x8x32xf32>
    %cst_6 = arith.constant dense<0.000000e+00> : vector<8x8xf32>
    %16 = vector.multi_reduction <add>, %15, %cst_6 [2] : vector<8x8x32xf32> to vector<8x8xf32>
    %17 = arith.mulf %0, %0 : vector<8x32xf32>
    %cst_7 = arith.constant dense<0.000000e+00> : vector<8xf32>
    %18 = vector.multi_reduction <add>, %17, %cst_7 [1] : vector<8x32xf32> to vector<8xf32>
    %19 = vector.shape_cast %18 : vector<8xf32> to vector<8x1xf32>
    %cst_8 = arith.constant 1.000000e-24 : f32
    %20 = vector.broadcast %cst_8 : f32 to vector<8x1xf32>
    %21 = arith.maximumf %19, %20 : vector<8x1xf32>
    %22 = math.rsqrt %21 : vector<8x1xf32>
    %cst_9 = arith.constant 14.2857141 : f32
    %23 = vector.broadcast %cst_9 : f32 to vector<8x1xf32>
    %24 = arith.mulf %22, %23 : vector<8x1xf32>
    %cst_10 = arith.constant 1.000000e-24 : f32
    %25 = vector.broadcast %cst_10 : f32 to vector<8x8xf32>
    %26 = arith.maximumf %16, %25 : vector<8x8xf32>
    %27 = math.rsqrt %26 : vector<8x8xf32>
    %28 = vector.broadcast %24 : vector<8x1xf32> to vector<8x8xf32>
    %29 = arith.mulf %28, %27 : vector<8x8xf32>
    %30 = arith.mulf %14, %29 : vector<8x8xf32>
    %c-1_i32 = arith.constant -1 : i32
    %31 = vector.broadcast %c-1_i32 : i32 to vector<8x8xi32>
    %32 = arith.cmpi ne, %3, %31 : vector<8x8xi32>
    %33 = vector.broadcast %4 : vector<8x1xi32> to vector<8x8xi32>
    %34 = arith.cmpi eq, %3, %33 : vector<8x8xi32>
    %35 = arith.andi %34, %32 : vector<8x8xi1>
    %36 = arith.extui %35 : vector<8x8xi1> to vector<8x8xi32>
    %37 = arith.sitofp %36 : vector<8x8xi32> to vector<8x8xf32>
    %38 = arith.extui %32 : vector<8x8xi1> to vector<8x8xi32>
    %39 = arith.sitofp %38 : vector<8x8xi32> to vector<8x8xf32>
    %cst_11 = arith.constant dense<0.000000e+00> : vector<8xf32>
    %40 = vector.multi_reduction <add>, %37, %cst_11 [1] : vector<8x8xf32> to vector<8xf32>
    %41 = vector.shape_cast %40 : vector<8xf32> to vector<8x1xf32>
    %cst_12 = arith.constant 0.000000e+00 : f32
    %42 = vector.broadcast %cst_12 : f32 to vector<8x1xf32>
    %43 = arith.cmpf ogt, %41, %42 : vector<8x1xf32>
    %44 = math.exp %30 : vector<8x8xf32>
    %45 = arith.mulf %44, %39 : vector<8x8xf32>
    %46 = arith.mulf %45, %37 : vector<8x8xf32>
    %cst_13 = arith.constant dense<0.000000e+00> : vector<8xf32>
    %47 = vector.multi_reduction <add>, %46, %cst_13 [1] : vector<8x8xf32> to vector<8xf32>
    %48 = vector.shape_cast %47 : vector<8xf32> to vector<8x1xf32>
    %cst_14 = arith.constant dense<0.000000e+00> : vector<8xf32>
    %49 = vector.multi_reduction <add>, %45, %cst_14 [1] : vector<8x8xf32> to vector<8xf32>
    %50 = vector.shape_cast %49 : vector<8xf32> to vector<8x1xf32>
    %cst_15 = arith.constant 1.000000e-10 : f32
    %51 = vector.broadcast %cst_15 : f32 to vector<8x1xf32>
    %52 = arith.addf %50, %51 : vector<8x1xf32>
    %53 = arith.divf %48, %52 : vector<8x1xf32>
    %cst_16 = arith.constant 1.000000e-10 : f32
    %54 = vector.broadcast %cst_16 : f32 to vector<8x1xf32>
    %55 = arith.addf %53, %54 : vector<8x1xf32>
    %56 = math.log %55 : vector<8x1xf32>
    %cst_17 = arith.constant 0.000000e+00 : f32
    %57 = vector.broadcast %cst_17 : f32 to vector<8x1xf32>
    %58 = arith.subf %57, %56 : vector<8x1xf32>
    %59 = tpu.weird %58 : vector<8x1xf32> -> vector<8x1xi1>
    %cst_18 = arith.constant dense<true> : vector<8x1xi1>
    %60 = arith.xori %59, %cst_18 : vector<8x1xi1>
    %61 = arith.andi %43, %60 : vector<8x1xi1>
    %62 = arith.andi %10, %61 : vector<8x1xi1>
    %cst_19 = arith.constant 0.000000e+00 : f32
    %63 = vector.broadcast %cst_19 : f32 to vector<8x1xf32>
    %64 = arith.select %62, %58, %63 : vector<8x1xi1>, vector<8x1xf32>
    %65 = vector.shape_cast %64 : vector<8x1xf32> to vector<1x8x1xf32>
    %cst_20 = arith.constant dense<0.000000e+00> : vector<1xf32>
    %66 = vector.multi_reduction <add>, %65, %cst_20 [1, 2] : vector<1x8x1xf32> to vector<1xf32>
    %67 = vector.shape_cast %66 : vector<1xf32> to vector<1x1x1xf32>
    %68 = vector.extract %67[0, 0, 0] : f32 from vector<1x1x1xf32>
    %69 = arith.extui %62 : vector<8x1xi1> to vector<8x1xi32>
    %70 = arith.sitofp %69 : vector<8x1xi32> to vector<8x1xf32>
    %71 = vector.shape_cast %70 : vector<8x1xf32> to vector<1x8x1xf32>
    %cst_21 = arith.constant dense<0.000000e+00> : vector<1xf32>
    %72 = vector.multi_reduction <add>, %71, %cst_21 [1, 2] : vector<1x8x1xf32> to vector<1xf32>
    %73 = vector.shape_cast %72 : vector<1xf32> to vector<1x1x1xf32>
    %74 = vector.extract %73[0, 0, 0] : f32 from vector<1x1x1xf32>
    %75 = tpu.iota {dimensions = array<i32: 2>} : vector<1x8x128xi32>
    %c0_i32 = arith.constant 0 : i32
    %76 = vector.broadcast %c0_i32 : i32 to vector<1x8x128xi32>
    %77 = arith.cmpi eq, %75, %76 : vector<1x8x128xi32>
    %c1_i32 = arith.constant 1 : i32
    %78 = vector.broadcast %c1_i32 : i32 to vector<1x8x128xi32>
    %79 = arith.cmpi eq, %75, %78 : vector<1x8x128xi32>
    %cst_22 = arith.constant 0.000000e+00 : f32
    %80 = vector.broadcast %74 : f32 to vector<1x8x128xf32>
    %81 = vector.broadcast %cst_22 : f32 to vector<1x8x128xf32>
    %82 = arith.select %79, %80, %81 : vector<1x8x128xi1>, vector<1x8x128xf32>
    %83 = vector.broadcast %68 : f32 to vector<1x8x128xf32>
    %84 = arith.select %77, %83, %82 : vector<1x8x128xi1>, vector<1x8x128xf32>
    %c0_23 = arith.constant 0 : index
    %c0_24 = arith.constant 0 : index
    %c0_25 = arith.constant 0 : index
    %85 = vector.load %arg4[%c0_23, %c0_24, %c0_25] : memref<1x8x128xf32, #tpu.memory_space<vmem>>, vector<1x8x128xf32>
    tpu.vector_store %arg4[%c0_23, %c0_24, %c0_25], %84 {strides = array<i32>} : memref<1x8x128xf32, #tpu.memory_space<vmem>>, vector<1x8x128xf32>,
    return
  }
  func.func @transform_0(%arg0: i32) -> (i32, i32) {
    %c0_i32 = arith.constant 0 : i32
    %c0_i32_0 = arith.constant 0 : i32
    return %arg0, %c0_i32 : i32, i32
  }
  func.func @transform_1(%arg0: i32) -> (i32, i32) {
    %c0_i32 = arith.constant 0 : i32
    %c0_i32_0 = arith.constant 0 : i32
    return %arg0, %c0_i32 : i32, i32
  }
  func.func @transform_2(%arg0: i32) -> (i32, i32, i32) {
    %c0_i32 = arith.constant 0 : i32
    %c0_i32_0 = arith.constant 0 : i32
    %c0_i32_1 = arith.constant 0 : i32
    return %arg0, %c0_i32, %c0_i32_0 : i32, i32, i32
  }
  func.func @transform_3(%arg0: i32) -> (i32, i32, i32) {
    %c0_i32 = arith.constant 0 : i32
    %c0_i32_0 = arith.constant 0 : i32
    %c0_i32_1 = arith.constant 0 : i32
    return %arg0, %c0_i32, %c0_i32_0 : i32, i32, i32
  }
}

</mosaic_0001>

<bundles_post_ra>
// kernel: simple_contrastive_loss.1
= control target key start
LH: loop header
LB: loop body
LE: loop exit
PB: predicated region body
PF: predicated region fallthrough
CT: control target
= control target key end

     0   :  { %8 = vsyncpa [#allocation3], 0  ;;  %s1496_s0 = inlined_call_operand.hbm [shape: f32[12,32], index: 0, kind: input, shape index: {}]   ;;  %s1497_s1 = inlined_call_operand.vmem [shape: s32[12,9], index: 1, kind: input, shape index: {}]   ;;  %s1498_s2 = inlined_call_operand.vmem [shape: f32[12,8,32], index: 2, kind: input, shape index: {}]   ;;  %s1499_s3 = inlined_call_operand.vmem [shape: f32[2,8,128], index: 3, kind: output, shape index: {}]  }
   0x1   :  { %10 = vsyncpa [#allocation3 + $0x1], 0  ;;  %s1227_s12 = smov 0   ;;  %s1229_s13 = smov 0  }
   0x2   :  { %s1231_s14 = smov 0   ;;  %s1233_s15 = smov 0  }
   0x3 LB: > { %s1246_s16 = sadd.s32 4294967295, %s1199_s15   ;;  %s1249_s17 = sadd.s32 1, %s1199_s15   ;;  %s1199_s15 = sphi %s1233_s15, %s1507_s15   ;;  %s1195_s14 = sphi %s1231_s14, %s1506_s14   ;;  %s1191_s13 = sphi %s1229_s13, %s1505_s13   ;;  %s1187_s12 = sphi %s1227_s12, %s1504_s12  }
   0x4   : > { %s20_s18 = ssub.s32 %s1199_s15, %s1249_s17  ;;  %s23_s19 = sadd.s32 1, %s1195_s14 }
   0x5   : > { %p21_p0 = scmp.eq.s32.totalorder %s20_s18, 0  ;;  %p30_p1 = scmp.ne.s32.totalorder %s1195_s14, %s1191_s13 }
   0x6   : > { %p31_p2 = scmp.eq.s32.totalorder %s1199_s15, 0  ;;  %p36_p3 = scmp.ne.s32.totalorder %s1191_s13, %s1187_s12 }
   0x7   : > { %s1259_s20 = scalar_select %p21_p0, %s1195_s14, %s23_s19  }
   0x8   : > { %p32_p4 = por %p31_p2, %p30_p1  ;;  %p37_p5 = scmp.eq.s32.totalorder %s1246_s16, 0 }
   0x9   : > { %p1055_p6 = scmp.lt.s32.totalorder %s1199_s15, 2  ;;  %s138_s22 = sand.u32 1, %s1195_s14  }
   0xa   : > { %p1263_p7 = por %p37_p5, %p36_p3  ;;  %s1031_s23 = sshll.u32 %s138_s22, 3 }
   0xb   : > { %s1032_s24 = sshll.u32 %s1199_s15, 7  ;;  %s142_s28 = scalar_lea.vmem [#allocation2], %s1031_s23 }
   0xc   : > { %s1272_s27 = scalar_lea.hbm %s1496_s0, %s1032_s24  ;;  %s149_s29 = sshll.u32 %s142_s28, 4  ;;  %s1274_s29 = int_to_ptr.vmem [resolvable:$true] %s149_s29 }
   0xd   : > { %p1276_p8 = pnand %p1055_p6, %p32_p4  ;;  %s139_s4 = scalar_lea.sflag [#allocation3], %s138_s22 }
   0xe   : > { %s1135_s5 = scalar_lea.hbm %s1272_s27, 128  ;;  %s1140_s8 = scalar_lea.hbm %s1496_s0, 256 }
   0xf   : > { %p1136_p11 = scmp.ne.s32.totalorder %s1272_s27, %s1135_s5  ;;  %p1137_p12 = pneg %p1276_p8 }
  0x10   : > { %p1141_p1 = scmp.lt.u32.totalorder %s1272_s27, %s1496_s0  ;;  %p1142_p2 = scmp.lt.u32.totalorder %s1140_s8, %s1135_s5 }
  0x11   : > { %p1138_p13 = pnand %p1137_p12, %p1136_p11  ;;  %p1144_p4 = scmp.lt.u32.totalorder %s1135_s5, %s1272_s27 }
  0x12   : > { %p1143_p3 = por %p1142_p2, %p1141_p1 }
  0x13   : > { %p1139_p0 = pneg %p1138_p13 }
  0x14   : > { %p1145_p5 = por %p1144_p4, %p1143_p3 }
  0x16   : > { %p1146_p6 = pnand %p1145_p5, %p1139_p0 }
  0x18   : > { %1149 = shalt.err (!%p1146_p6)
}
  0x19   : > { %s1150_s11 = scalar_lea.vmem %s1274_s29, 128  ;;  %s1201_s12 = smov [#allocation2]  }
  0x1a   : > { %p1151_p11 = scmp.ne.s32.totalorder %s1274_s29, %s1150_s11  ;;  %s1155_s18 = sshll.u32 %s1201_s12, 4  ;;  %s1156_s18 = int_to_ptr.vmem [resolvable:$false] %s1155_s18 }
  0x1b   : > { %s1157_s19 = scalar_lea.vmem %s1156_s18, 256  ;;  %p1158_p10 = scmp.lt.s32.totalorder %s1274_s29, %s1156_s18 }
  0x1c   : > { %p1153_p13 = pnand %p1151_p11, %p1137_p12  ;;  %p1159_p1 = scmp.lt.s32.totalorder %s1157_s19, %s1150_s11 }
  0x1e   : > { %p1154_p9 = pneg %p1153_p13  ;;  %p1160_p2 = por %p1159_p1, %p1158_p10 }
  0x20   : > { %p1161_p3 = pnand %p1160_p2, %p1154_p9 }
  0x22   : > { %1164 = shalt.err (!%p1161_p3)
}
  0x23   : > { %1054 = dma.hbm_to_vmem [thread:$0]  (!%p1276_p8), %s1272_s27, 128, %s1274_s29, %s139_s4  }
  0x24   : > { %p1502_p0 = scmp.lt.s32.totalorder %s1199_s15, 3  ;;  %p1503_p4 = scmp.ge.s32.totalorder %s1199_s15, 1 }
  0x26   : > { %p179_p12 = pnand %p1503_p4, %p1502_p0 }
  0x27   : > { %s184_s22 = sand.u32 (!%p179_p12), 1, %s1191_s13  }
  0x28   : > { %182 = sbr.rel (%p179_p12) target bundleno = 913 (0x391), region = 32  ;;  %s1312_s23 = sshll.u32 (!%p179_p12), %s184_s22, 3 }
  0x29   : > { %s185_s24 = scalar_lea.sflag (!%p179_p12), [#allocation3], %s184_s22  ;;  %s188_s25 = scalar_lea.vmem (!%p179_p12), [#allocation2], %s1312_s23 }
  0x2f   : > { %1182 = dma.done.wait (%p1263_p7), %s185_s24, 128  }
  0x30   : > { %1184 = vsyncadd (%p1263_p7), %s185_s24, 4294967168  ;;  %s1320_s26 = sshll.u32 %s1246_s16, 3  ;;  %v256_v0 = vlaneseq  ;;  %v1202_v1 = vmov 1966171168   ;;  %v1203_v3 = vmov 8   ;;  %vm359_vm0 = vcmask 261120  }
  0x31   : > { %p232_p8 = scmp.lt.s32.totalorder %s1320_s26, 11  ;;  %v264_v2 = vunpack.c.l.s4 %v1202_v1  ;;  %1093 = vset.pattern.permute.xlu1 %v1203_v3  ;;  %v245_v20 = vld [vmem:[%s188_s25] sm:$0xff]  ;;  %p223_p7 = scmp.lt.s32.totalorder %s1246_s16, 1  ;;  %vm481_vm2 = vcmask 1041409   ;;  %vm483_vm3 = vcmask 1042434   ;;  %vm485_vm4 = vcmask 1043459  }
  0x32   : > { %v1325_v4 = vshrl.u32 %v256_v0, 7  ;;  %v262_v35 = vcombine.high %v245_v20, %v245_v20  ;;  %v416_v37 = vmul.f32 %v245_v20, %v245_v20  ;;  %vm487_vm5 = vcmask 1044484  }
  0x33   : > { %s233_s15 = scalar_select %p232_p8, %s1320_s26, 11  ;;  %v265_v5 = vunpack.c.0.s8 %v264_v2  ;;  %vm489_vm6 = vcmask 1045509   ;;  %vm491_vm7 = vcmask 1046534   ;;  %vm493_vm8 = vcmask 1047559  }
  0x34   : > { %v1343_v29 = vsub.s32 0, %v1325_v4  ;;  %v417_v41 = vsel %vm359_vm0, %v416_v37, 0.0  ;;  %s1509_s16 = smov (!%p223_p7, %s1246_s16), 1  ;;  %vm580_vm11 = vcmask 64512   ;;  %vm1206_vm14 = vmmov 1  }
  0x35   : > { %s1037_s27 = sshll.u32 %s233_s15, 3  ;;  %v268_v14 = vsub.s32 %v265_v5, %v1325_v4  ;;  %s1035_s30 = sshll.u32 %s1509_s16, 3 }
  0x36   : > { %s235_s29 = scalar_lea.vmem %s1498_s2, %s1037_s27  ;;  %s226_s6 = scalar_lea.vmem %s1497_s1, %s1035_s30 }
  0x37   : > { %v247_v6 = vld [vmem:[%s235_s29] sm:$0xff]  ;;  %v249_v7 = vld [vmem:[%s235_s29 + $0x10] sm:$0xff]  ;;  %v248_v8 = vld [vmem:[%s235_s29 + $0x8] sm:$0xff]  ;;  %v269_v25 = vrot.slane %v245_v20, %v268_v14  ;;  %v276_v40 = vrot.slane %v262_v35, %v268_v14  ;;  %s244_s11 = scalar_lea.vmem %s1499_s3, %s1035_s30 }
  0x38   : > { %v384_v9 = vmul.f32 %v247_v6, %v247_v6  ;;  %v386_v10 = vmul.f32 %v249_v7, %v249_v7  ;;  %v385_v11 = vmul.f32 %v248_v8, %v248_v8  ;;  %v250_v12 = vld [vmem:[%s235_s29 + $0x18] sm:$0xff]  ;;  %v1330_v13 = vld [vmem:[%s235_s29 + $0x20] sm:$0xff]  ;;  %v252_v16 = vld [vmem:[%s235_s29 + $0x28] sm:$0xff] }
  0x39   : > { %v387_v15 = vmul.f32 %v250_v12, %v250_v12  ;;  %v388_v19 = vmul.f32 %v1330_v13, %v1330_v13  ;;  %v389_v23 = vmul.f32 %v252_v16, %v252_v16  ;;  %v253_v24 = vld [vmem:[%s235_s29 + $0x30] sm:$0xff]  ;;  %v254_v26 = vld [vmem:[%s235_s29 + $0x38] sm:$0xff]  ;;  %v285_v32 = vrot.slane %v269_v25, %v268_v14  ;;  %v1367_v59 = vld [vmem:[%s226_s6] sm:$0xff] }
  0x3a   : > { %v392_v17 = vsel %vm359_vm0, %v384_v9, 0.0  ;;  %v398_v18 = vsel %vm359_vm0, %v386_v10, 0.0  ;;  %v395_v21 = vsel %vm359_vm0, %v385_v11, 0.0  ;;  %v390_v28 = vmul.f32 %v253_v24, %v253_v24 }
  0x3b   : > { %393 = vadd.xlane.f32.xlu0 %v392_v17  ;;  %399 = vadd.xlane.f32.xlu1 %v398_v18  ;;  %v401_v22 = vsel %vm359_vm0, %v387_v15, 0.0  ;;  %v404_v27 = vsel %vm359_vm0, %v388_v19, 0.0  ;;  %v407_v30 = vsel %vm359_vm0, %v389_v23, 0.0  ;;  %v391_v31 = vmul.f32 %v254_v26, %v254_v26 }
  0x3c   : > { %v277_v33 = vcombine.high %v269_v25, %v269_v25  ;;  %v410_v34 = vsel %vm359_vm0, %v390_v28, 0.0  ;;  %v314_v38 = vrot.slane %v285_v32, %v1343_v29  ;;  %v307_v44 = vcombine.high %v285_v32, %v285_v32 }
  0x3d   : > { %v413_v36 = vsel %vm359_vm0, %v391_v31, 0.0  ;;  %v278_v45 = vcombine.high %v276_v40, %v276_v40  ;;  %v292_v50 = vrot.slane %v276_v40, %v268_v14  ;;  %vm570_vm1 = vcmp.ne.s32.totalorder %v1367_v59, 4294967295 }
  0x3e   : > { %v299_v39 = vrot.slane %v277_v33, %v268_v14  ;;  %v351_v42 = vmul.f32 %v314_v38, %v247_v6  ;;  %v322_v48 = vrot.slane %v307_v44, %v1343_v29  ;;  %v1204_v10 = vmov 0.0  }
  0x3f   : > { %396 = vadd.xlane.f32.xlu0 %v395_v21  ;;  %402 = vadd.xlane.f32.xlu1 %v401_v22  ;;  %v306_v54 = vrot.slane %v278_v45, %v268_v14  ;;  %v308_v58 = vcombine.high %v292_v50, %v292_v50  ;;  %v1382_v11 = vsel %vm570_vm1, 1.0, %v1204_v10 }
  0x40   : > { %v318_v43 = vrot.slane %v299_v39, %v1343_v29  ;;  %v360_v46 = vsel %vm359_vm0, %v351_v42, 0.0  ;;  %v309_v49 = vcombine.high %v299_v39, %v299_v39  ;;  %v353_v52 = vmul.f32 %v322_v48, %v249_v7 }
  0x41   : > { %v334_v57 = vrot.slane %v306_v54, %v1343_v29  ;;  %v338_v62 = vrot.slane %v308_v58, %v1343_v29  ;;  %v310_v63 = vcombine.high %v306_v54, %v306_v54  ;;  %v605_v14 = vrot.slane %v1382_v11, %v1343_v29 }
  0x42   : > { %v352_v47 = vmul.f32 %v318_v43, %v248_v8  ;;  %v326_v53 = vrot.slane %v309_v49, %v1343_v29  ;;  %v366_v55 = vsel %vm359_vm0, %v353_v52, 0.0  ;;  %v330_v8 = vrot.slane %v292_v50, %v1343_v29 }
  0x43   : > { %405 = vadd.xlane.f32.xlu0 %v404_v27  ;;  %408 = vadd.xlane.f32.xlu1 %v407_v30  ;;  %v356_v61 = vmul.f32 %v334_v57, %v252_v16  ;;  %v357_v2 = vmul.f32 %v338_v62, %v253_v24  ;;  %v342_v3 = vrot.slane %v310_v63, %v1343_v29  ;;  %v507_v58 = vsub.s32 1, %v1325_v4 }
  0x44   : > { %v363_v51 = vsel %vm359_vm0, %v352_v47, 0.0  ;;  %v354_v56 = vmul.f32 %v326_v53, %v250_v12  ;;  %v355_v9 = vmul.f32 %v330_v8, %v1330_v13 }
  0x45   : > { %v375_v1 = vsel %vm359_vm0, %v356_v61, 0.0  ;;  %v378_v5 = vsel %vm359_vm0, %v357_v2, 0.0  ;;  %v358_v6 = vmul.f32 %v342_v3, %v254_v26  ;;  %v1388_v26 = vand.u32 127, %v256_v0 }
  0x46   : > { %v369_v60 = vsel %vm359_vm0, %v354_v56, 0.0  ;;  %v372_v12 = vsel %vm359_vm0, %v355_v9, 0.0  ;;  %v612_v2 = vrot.slane %v1382_v11, %v507_v58 }
  0x47   : > { %411 = vadd.xlane.f32.xlu0 %v410_v34  ;;  %414 = vadd.xlane.f32.xlu1 %v413_v36  ;;  %v381_v7 = vsel %vm359_vm0, %v358_v6, 0.0  ;;  %v1392_v32 = vsub.s32 %v1388_v26, %v1325_v4  ;;  %v521_v6 = vsub.s32 3, %v1325_v4 }
  0x4b   : > { %418 = vadd.xlane.f32.xlu0 %v417_v41 }
  0x4f   : > { %361 = vadd.xlane.f32.xlu0 %v360_v46 }
  0x53   : > { %364 = vadd.xlane.f32.xlu0 %v363_v51 }
  0x57   : > { %367 = vadd.xlane.f32.xlu0 %v366_v55 }
  0x58   : > { %572 = vperm.xlu1 %1093, %v1367_v59  }
  0x5b   : > { %370 = vadd.xlane.f32.xlu0 %v369_v60 }
  0x5f   : > { %376 = vadd.xlane.f32.xlu0 %v375_v1  ;;  %v514_v1 = vsub.s32 2, %v1325_v4 }
  0x63   : > { %379 = vadd.xlane.f32.xlu0 %v378_v5  ;;  %v549_v5 = vsub.s32 7, %v1325_v4 }
  0x67   : > { %382 = vadd.xlane.f32.xlu0 %v381_v7  ;;  %v1205_v7 = vmov 0  }
  0x68   : > { %1094 = vset.pattern.permute.xlu0 %v1205_v7  ;;  %1095 = vset.pattern.permute.xlu1 %v1205_v7 }
  0x7c   : > { %373 = vadd.xlane.f32.xlu1 %v372_v12  ;;  %v528_v12 = vsub.s32 4, %v1325_v4 }
  0x7d   : > { %607 = vbcast.lane.b32.xlu0 %v605_v14, 256  ;;  %v626_v14 = vrot.slane %v1382_v11, %v521_v6 }
  0xc8   : > { %v394_v15 = vpop.xlane.xlu0 %393  ;;  %v400_v16 = vpop.xlane.xlu1 %399 }
  0xc9   : > { %v423_v17 = vmax.f32 %v394_v15, 1e-24  ;;  %v425_v18 = vmax.f32 %v400_v16, 1e-24 }
  0xcb   : > { %1097 = vrsqrt.f32 %v423_v17  ;;  %v535_v17 = vsub.s32 5, %v1325_v4 }
  0xcc   : > { %v397_v19 = vpop.xlane.xlu0 %396  ;;  %v403_v20 = vpop.xlane.xlu1 %402  ;;  %1099 = vrsqrt.f32 %v425_v18 }
  0xcd   : > { %v424_v13 = vmax.f32 %v397_v19, 1e-24  ;;  %v426_v21 = vmax.f32 %v403_v20, 1e-24  ;;  %v640_v18 = vrot.slane %v1382_v11, %v535_v17  ;;  %v542_v20 = vsub.s32 6, %v1325_v4 }
  0xcf   : > { %1101 = vrsqrt.f32 %v424_v13  ;;  %v654_v13 = vrot.slane %v1382_v11, %v549_v5 }
  0xd0   : > { %1103 = vrsqrt.f32 %v426_v21  ;;  %v406_v22 = vpop.xlane.xlu0 %405  ;;  %v409_v23 = vpop.xlane.xlu1 %408 }
  0xd1   : > { %v427_v24 = vmax.f32 %v406_v22, 1e-24  ;;  %v428_v25 = vmax.f32 %v409_v23, 1e-24 }
  0xd3   : > { %1105 = vrsqrt.f32 %v427_v24  ;;  %v619_v24 = vrot.slane %v1382_v11, %v514_v1 }
  0xd4   : > { %1107 = vrsqrt.f32 %v428_v25  ;;  %v412_v27 = vpop.xlane.xlu0 %411  ;;  %v415_v28 = vpop.xlane.xlu1 %414  ;;  %v633_v25 = vrot.slane %v1382_v11, %v528_v12 }
  0xd5   : > { %v429_v30 = vmax.f32 %v412_v27, 1e-24  ;;  %v430_v31 = vmax.f32 %v415_v28, 1e-24  ;;  %v1098_v33 = vpop.eup %1097  ;;  %v647_v28 = vrot.slane %v1382_v11, %v542_v20 }
  0xd6   : > { %v1100_v34 = vpop.eup %1099  ;;  %v452_v38 = vrot.slane %v1098_v33, %v1392_v32 }
  0xd7   : > { %1109 = vrsqrt.f32 %v429_v30  ;;  %v460_v40 = vrot.slane %v1100_v34, %v1392_v32 }
  0xd8   : > { %1111 = vrsqrt.f32 %v430_v31  ;;  %v419_v35 = vpop.xlane.xlu0 %418  ;;  %v573_v15 = vpop.permute.xlu1 %572 }
  0xd9   : > { %v1102_v36 = vpop.eup %1101  ;;  %v420_v37 = vmax.f32 %v419_v35, 1e-24  ;;  %vm574_vm9 = vcmp.eq.s32.totalorder %v1367_v59, %v573_v15 }
  0xda   : > { %v1104_v0 = vpop.eup %1103  ;;  %v456_v39 = vrot.slane %v1102_v36, %v1392_v32  ;;  %vm575_vm10 = vmand %vm574_vm9, %vm570_vm1 }
  0xdb   : > { %v464_v41 = vrot.slane %v1104_v0, %v1392_v32  ;;  %1113 = vrsqrt.f32 %v420_v37  ;;  %v1425_v21 = vsel %vm575_vm10, 1.0, %v1204_v10 }
  0xdc   : > { %v482_v42 = vsel %vm481_vm2, %v456_v39, %v452_v38  ;;  %v685_v23 = vrot.slane %v1425_v21, %v507_v58  ;;  %v699_v59 = vrot.slane %v1425_v21, %v521_v6  ;;  %v713_v27 = vrot.slane %v1425_v21, %v535_v17  ;;  %v362_v36 = vpop.xlane.xlu0 %361 }
  0xdd   : > { %v1106_v43 = vpop.eup %1105  ;;  %v484_v44 = vsel %vm483_vm3, %v460_v40, %v482_v42  ;;  %v727_v30 = vrot.slane %v1425_v21, %v549_v5  ;;  %v678_v31 = vrot.slane %v1425_v21, %v1343_v29  ;;  %v692_v33 = vrot.slane %v1425_v21, %v514_v1 }
  0xde   : > { %v1108_v45 = vpop.eup %1107  ;;  %v468_v46 = vrot.slane %v1106_v43, %v1392_v32  ;;  %v486_v47 = vsel %vm485_vm4, %v464_v41, %v484_v44  ;;  %v706_v34 = vrot.slane %v1425_v21, %v528_v12  ;;  %v720_v35 = vrot.slane %v1425_v21, %v542_v20 }
  0xdf   : > { %v472_v48 = vrot.slane %v1108_v45, %v1392_v32 }
  0xe0   : > { %v488_v49 = vsel %vm487_vm5, %v468_v46, %v486_v47  ;;  %v365_v11 = vpop.xlane.xlu0 %364 }
  0xe1   : > { %v1110_v50 = vpop.eup %1109  ;;  %v490_v54 = vsel %vm489_vm6, %v472_v48, %v488_v49 }
  0xe2   : > { %v1112_v51 = vpop.eup %1111  ;;  %v476_v52 = vrot.slane %v1110_v50, %v1392_v32 }
  0xe3   : > { %v480_v53 = vrot.slane %v1112_v51, %v1392_v32 }
  0xe4   : > { %v492_v55 = vsel %vm491_vm7, %v476_v52, %v490_v54  ;;  %v368_v37 = vpop.xlane.xlu0 %367 }
  0xe5   : > { %v1114_v56 = vpop.eup %1113  ;;  %v494_v60 = vsel %vm493_vm8, %v480_v53, %v492_v55 }
  0xe6   : > { %v422_v57 = vmul.f32 14.285714, %v1114_v56 }
  0xe8   : > { %v496_v61 = vmul.f32 %v494_v60, %v422_v57  ;;  %v371_v0 = vpop.xlane.xlu0 %370 }
  0xea   : > { %v508_v62 = vrot.slane %v496_v61, %v507_v58  ;;  %v501_v63 = vrot.slane %v496_v61, %v1343_v29  ;;  %v515_v3 = vrot.slane %v496_v61, %v514_v1  ;;  %v550_v8 = vrot.slane %v496_v61, %v549_v5 }
  0xeb   : > { %v522_v9 = vrot.slane %v496_v61, %v521_v6  ;;  %v529_v16 = vrot.slane %v496_v61, %v528_v12  ;;  %v536_v19 = vrot.slane %v496_v61, %v535_v17  ;;  %v543_v22 = vrot.slane %v496_v61, %v542_v20 }
  0xec   : > { %510 = vbcast.lane.b32.xlu1 %v508_v62, 256  ;;  %503 = vbcast.lane.b32.xlu0 %v501_v63, 256  ;;  %v377_v38 = vpop.xlane.xlu0 %376 }
  0xf0   : > { %614 = vbcast.lane.b32.xlu1 %v612_v2, 256  ;;  %517 = vbcast.lane.b32.xlu0 %v515_v3, 256  ;;  %v380_v39 = vpop.xlane.xlu0 %379 }
  0xf4   : > { %552 = vbcast.lane.b32.xlu1 %v550_v8, 256  ;;  %524 = vbcast.lane.b32.xlu0 %v522_v9, 256  ;;  %v383_v40 = vpop.xlane.xlu0 %382 }
  0xf8   : > { %628 = vbcast.lane.b32.xlu1 %v626_v14, 256  ;;  %531 = vbcast.lane.b32.xlu0 %v529_v16, 256  ;;  %v608_v29 = vpop.permute.xlu0 %607 }
  0xfc   : > { %642 = vbcast.lane.b32.xlu1 %v640_v18, 256  ;;  %538 = vbcast.lane.b32.xlu0 %v536_v19, 256 }
 0x100   : > { %656 = vbcast.lane.b32.xlu1 %v654_v13, 256  ;;  %545 = vbcast.lane.b32.xlu0 %v543_v22, 256 }
 0x104   : > { %687 = vbcast.lane.b32.xlu1 %v685_v23, 256  ;;  %621 = vbcast.lane.b32.xlu0 %v619_v24, 256 }
 0x108   : > { %701 = vbcast.lane.b32.xlu1 %v699_v59, 256  ;;  %635 = vbcast.lane.b32.xlu0 %v633_v25, 256 }
 0x109   : > { %v374_v41 = vpop.xlane.xlu1 %373 }
 0x10c   : > { %715 = vbcast.lane.b32.xlu1 %v713_v27, 256  ;;  %649 = vbcast.lane.b32.xlu0 %v647_v28, 256 }
 0x110   : > { %729 = vbcast.lane.b32.xlu1 %v727_v30, 256  ;;  %680 = vbcast.lane.b32.xlu0 %v678_v31, 256 }
 0x114   : > { %694 = vbcast.lane.b32.xlu0 %v692_v33, 256 }
 0x118   : > { %708 = vbcast.lane.b32.xlu0 %v706_v34, 256 }
 0x11c   : > { %722 = vbcast.lane.b32.xlu0 %v720_v35, 256 }
 0x15e   : > { %v511_v42 = vpop.permute.xlu1 %510  ;;  %v504_v43 = vpop.permute.xlu0 %503 }
 0x15f   : > { %v563_v44 = vmul.f32 %v511_v42, %v365_v11  ;;  %v562_v45 = vmul.f32 %v504_v43, %v362_v36 }
 0x161   : > { %v587_v46 = vmul.f32 1.442695, %v563_v44  ;;  %v585_v47 = vmul.f32 1.442695, %v562_v45 }
 0x162   : > { %v615_v48 = vpop.permute.xlu1 %614  ;;  %v518_v49 = vpop.permute.xlu0 %517 }
 0x163   : > { %1115 = vpow2.f32 %v587_v46  ;;  %v564_v50 = vmul.f32 %v518_v49, %v368_v37 }
 0x164   : > { %1117 = vpow2.f32 %v585_v47 }
 0x165   : > { %v589_v53 = vmul.f32 1.442695, %v564_v50 }
 0x166   : > { %v553_v51 = vpop.permute.xlu1 %552  ;;  %v525_v52 = vpop.permute.xlu0 %524 }
 0x167   : > { %v565_v54 = vmul.f32 %v525_v52, %v371_v0  ;;  %1119 = vpow2.f32 %v589_v53  ;;  %v569_v61 = vmul.f32 %v553_v51, %v383_v40 }
 0x169   : > { %v591_v55 = vmul.f32 1.442695, %v565_v54  ;;  %v599_v6 = vmul.f32 1.442695, %v569_v61 }
 0x16a   : > { %v532_v56 = vpop.permute.xlu0 %531  ;;  %v629_v57 = vpop.permute.xlu1 %628 }
 0x16b   : > { %v566_v58 = vmul.f32 %v532_v56, %v374_v41  ;;  %1121 = vpow2.f32 %v591_v55 }
 0x16d   : > { %v1116_v60 = vpop.eup %1115  ;;  %v593_v62 = vmul.f32 1.442695, %v566_v58 }
 0x16e   : > { %v1118_v63 = vpop.eup %1117  ;;  %v667_v1 = vmul.f32 %v1116_v60, %v615_v48  ;;  %v539_v2 = vpop.permute.xlu0 %538 }
 0x16f   : > { %1123 = vpow2.f32 %v593_v62  ;;  %v567_v3 = vmul.f32 %v539_v2, %v377_v38  ;;  %v666_v5 = vmul.f32 %v1118_v63, %v608_v29  ;;  %v643_v7 = vpop.permute.xlu1 %642 }
 0x170   : > { %834 = vperm.xlu1 %1095, %v667_v1  }
 0x171   : > { %v595_v8 = vmul.f32 1.442695, %v567_v3  ;;  %831 = vperm.xlu0 %1094, %v666_v5   ;;  %v1120_v14 = vpop.eup %1119 }
 0x172   : > { %v546_v9 = vpop.permute.xlu0 %545 }
 0x173   : > { %1125 = vpow2.f32 %v595_v8  ;;  %v568_v12 = vmul.f32 %v546_v9, %v380_v39  ;;  %v657_v19 = vpop.permute.xlu1 %656 }
 0x174   : > { %1127 = vpow2.f32 %v599_v6 }
 0x175   : > { %v597_v15 = vmul.f32 1.442695, %v568_v12  ;;  %v1122_v16 = vpop.eup %1121 }
 0x176   : > { %v622_v17 = vpop.permute.xlu0 %621  ;;  %v669_v18 = vmul.f32 %v1122_v16, %v629_v57 }
 0x177   : > { %1129 = vpow2.f32 %v597_v15  ;;  %v668_v20 = vmul.f32 %v1120_v14, %v622_v17  ;;  %v688_v59 = vpop.permute.xlu1 %687 }
 0x178   : > { %840 = vperm.xlu0 %1094, %v669_v18   ;;  %v740_v36 = vmul.f32 %v688_v59, %v667_v1 }
 0x179   : > { %v1124_v13 = vpop.eup %1123  ;;  %837 = vperm.xlu1 %1095, %v668_v20  }
 0x17a   : > { %v636_v22 = vpop.permute.xlu0 %635 }
 0x17b   : > { %v670_v23 = vmul.f32 %v1124_v13, %v636_v22  ;;  %v702_v35 = vpop.permute.xlu1 %701 }
 0x17c   : > { %v742_v38 = vmul.f32 %v702_v35, %v669_v18 }
 0x17d   : > { %v1126_v24 = vpop.eup %1125  ;;  %843 = vperm.xlu1 %1095, %v670_v23  }
 0x17e   : > { %v671_v25 = vmul.f32 %v1126_v24, %v643_v7  ;;  %v650_v27 = vpop.permute.xlu0 %649  ;;  %v1128_v28 = vpop.eup %1127 }
 0x17f   : > { %v673_v31 = vmul.f32 %v1128_v28, %v657_v19  ;;  %v716_v0 = vpop.permute.xlu1 %715 }
 0x180   : > { %846 = vperm.xlu0 %1094, %v671_v25   ;;  %v744_v41 = vmul.f32 %v716_v0, %v671_v25 }
 0x181   : > { %v1130_v30 = vpop.eup %1129 }
 0x182   : > { %v672_v33 = vmul.f32 %v1130_v30, %v650_v27  ;;  %v681_v34 = vpop.permute.xlu0 %680 }
 0x183   : > { %v739_v11 = vmul.f32 %v681_v34, %v666_v5  ;;  %v730_v42 = vpop.permute.xlu1 %729 }
 0x184   : > { %852 = vperm.xlu0 %1094, %v673_v31   ;;  %849 = vperm.xlu1 %1095, %v672_v33   ;;  %v746_v44 = vmul.f32 %v730_v42, %v673_v31 }
 0x186   : > { %v695_v37 = vpop.permute.xlu0 %694 }
 0x187   : > { %v741_v39 = vmul.f32 %v695_v37, %v668_v20  ;;  %v581_v37 = vsel %vm580_vm11, %v1425_v21, 0.0 }
 0x188   : > { %759 = vperm.xlu0 %1094, %v740_v36   ;;  %756 = vperm.xlu1 %1095, %v739_v11  }
 0x18a   : > { %v709_v40 = vpop.permute.xlu0 %708 }
 0x18b   : > { %v743_v29 = vmul.f32 %v709_v40, %v670_v23 }
 0x18c   : > { %765 = vperm.xlu0 %1094, %v742_v38   ;;  %762 = vperm.xlu1 %1095, %v741_v39  }
 0x18e   : > { %v723_v43 = vpop.permute.xlu0 %722 }
 0x18f   : > { %v745_v45 = vmul.f32 %v723_v43, %v672_v33 }
 0x190   : > { %771 = vperm.xlu0 %1094, %v744_v41   ;;  %768 = vperm.xlu1 %1095, %v743_v29   ;;  %v258_v29 = vstv %s1320_s26 }
 0x194   : > { %777 = vperm.xlu0 %1094, %v746_v44   ;;  %774 = vperm.xlu1 %1095, %v745_v45   ;;  %v259_v44 = vadd.s32 %v258_v29, %v1325_v4 }
 0x196   : > { %vm260_vm13 = vcmp.lt.s32.totalorder %v259_v44, 12 }
 0x1ef   : > { %v835_v46 = vpop.permute.xlu1 %834 }
 0x1f0   : > { %v832_v47 = vpop.permute.xlu0 %831  ;;  %v861_v49 = vrot.slane %v835_v46, %v1392_v32 }
 0x1f1   : > { %v857_v50 = vrot.slane %v832_v47, %v1392_v32 }
 0x1f3   : > { %v886_v54 = vsel %vm481_vm2, %v861_v49, %v857_v50 }
 0x1f7   : > { %v841_v51 = vpop.permute.xlu0 %840 }
 0x1f8   : > { %v838_v48 = vpop.permute.xlu1 %837  ;;  %v869_v58 = vrot.slane %v841_v51, %v1392_v32 }
 0x1f9   : > { %v865_v52 = vrot.slane %v838_v48, %v1392_v32 }
 0x1fb   : > { %v887_v56 = vsel %vm483_vm3, %v865_v52, %v886_v54 }
 0x1fc   : > { %v844_v53 = vpop.permute.xlu1 %843  ;;  %v888_v61 = vsel %vm485_vm4, %v869_v58, %v887_v56 }
 0x1fd   : > { %v873_v57 = vrot.slane %v844_v53, %v1392_v32 }
 0x1ff   : > { %v847_v55 = vpop.permute.xlu0 %846  ;;  %v889_v1 = vsel %vm487_vm5, %v873_v57, %v888_v61 }
 0x200   : > { %v877_v60 = vrot.slane %v847_v55, %v1392_v32 }
 0x202   : > { %v890_v5 = vsel %vm489_vm6, %v877_v60, %v889_v1 }
 0x203   : > { %v850_v62 = vpop.permute.xlu1 %849  ;;  %v853_v63 = vpop.permute.xlu0 %852 }
 0x204   : > { %v881_v2 = vrot.slane %v850_v62, %v1392_v32  ;;  %v885_v3 = vrot.slane %v853_v63, %v1392_v32 }
 0x206   : > { %v891_v6 = vsel %vm491_vm7, %v881_v2, %v890_v5 }
 0x207   : > { %v757_v7 = vpop.permute.xlu1 %756  ;;  %v760_v8 = vpop.permute.xlu0 %759  ;;  %v892_v9 = vsel %vm493_vm8, %v885_v3, %v891_v6 }
 0x208   : > { %v894_v12 = vsel %vm580_vm11, %v892_v9, 0.0  ;;  %v782_v14 = vrot.slane %v757_v7, %v1392_v32  ;;  %v786_v15 = vrot.slane %v760_v8, %v1392_v32 }
 0x209   : > { %895 = vadd.xlane.f32.xlu1 %v894_v12 }
 0x20a   : > { %v811_v19 = vsel %vm481_vm2, %v786_v15, %v782_v14  ;;  %vm909_vm2 = vcmask 7168  }
 0x20b   : > { %v763_v16 = vpop.permute.xlu1 %762  ;;  %v766_v17 = vpop.permute.xlu0 %765 }
 0x20c   : > { %v790_v18 = vrot.slane %v763_v16, %v1392_v32  ;;  %v794_v20 = vrot.slane %v766_v17, %v1392_v32 }
 0x20e   : > { %v812_v13 = vsel %vm483_vm3, %v790_v18, %v811_v19 }
 0x20f   : > { %v769_v22 = vpop.permute.xlu1 %768  ;;  %v772_v23 = vpop.permute.xlu0 %771  ;;  %v813_v59 = vsel %vm485_vm4, %v794_v20, %v812_v13  ;;  %vm933_vm4 = vcmp.eq.s32.totalorder %v1388_v26, 1 }
 0x210   : > { %v798_v24 = vrot.slane %v769_v22, %v1392_v32  ;;  %v802_v25 = vrot.slane %v772_v23, %v1392_v32 }
 0x212   : > { %v814_v27 = vsel %vm487_vm5, %v798_v24, %v813_v59  ;;  %vm932_vm5 = vcmp.eq.s32.totalorder %v1388_v26, 0 }
 0x213   : > { %v775_v28 = vpop.permute.xlu1 %774  ;;  %v778_v30 = vpop.permute.xlu0 %777  ;;  %v815_v34 = vsel %vm489_vm6, %v802_v25, %v814_v27 }
 0x214   : > { %v806_v31 = vrot.slane %v775_v28, %v1392_v32  ;;  %v810_v33 = vrot.slane %v778_v30, %v1392_v32 }
 0x216   : > { %v816_v35 = vsel %vm491_vm7, %v806_v31, %v815_v34 }
 0x217   : > { %v817_v36 = vsel %vm493_vm8, %v810_v33, %v816_v35 }
 0x218   : > { %v819_v11 = vsel %vm580_vm11, %v817_v36, 0.0 }
 0x219   : > { %820 = vadd.xlane.f32.xlu0 %v819_v11 }
 0x21d   : > { %582 = vadd.xlane.f32.xlu0 %v581_v37 }
 0x296   : > { %v896_v0 = vpop.xlane.xlu1 %895 }
 0x297   : > { %v897_v38 = vadd.f32 1e-10, %v896_v0 }
 0x299   : > { %1131 = vrcp.f32 %v897_v38 }
 0x2a3   : > { %v1132_v39 = vpop.eup %1131 }
 0x2a6   : > { %v821_v40 = vpop.xlane.xlu0 %820 }
 0x2a7   : > { %v899_v32 = vmul.f32 %v1132_v39, %v821_v40 }
 0x2a9   : > { %v900_v41 = vadd.f32 1e-10, %v899_v32 }
 0x2aa   : > { %v583_v46 = vpop.xlane.xlu0 %582 }
 0x2ab   : > { %1133 = vlog2.f32 %v900_v41  ;;  %vm584_vm0 = vcmp.gt.f32.partialorder %v583_v46, 0.0 }
 0x2b5   : > { %v1134_v42 = vpop.eup %1133 }
 0x2b6   : > { %v902_v43 = vmul.f32 0.6931472, %v1134_v42 }
 0x2b8   : > { %v903_v45 = vsub.f32 0.0, %v902_v43 }
 0x2ba   : > { %vm904_vm12 = vweird.f32 %v903_v45 }
 0x2bb   : > { %vm905_vm15 = vmxor %vm904_vm12, %vm1206_vm14 }
 0x2bc   : > { %vm906_vm1 = vmand %vm584_vm0, %vm905_vm15 }
 0x2bd   : > { %vm907_vm3 = vmand %vm260_vm13, %vm906_vm1 }
 0x2be   : > { %v1042_v21 = vsel %vm907_vm3, 1.0, %v1204_v10  ;;  %v908_v47 = vsel %vm907_vm3, %v903_v45, 0.0 }
 0x2bf   : > { %v922_v48 = vsel %vm909_vm2, %v1042_v21, 0.0  ;;  %v910_v49 = vsel %vm909_vm2, %v908_v47, 0.0 }
 0x2c0   : > { %923 = vadd.xlane.f32.xlu0 %v922_v48  ;;  %911 = vadd.xlane.f32.xlu1 %v910_v49 }
 0x34d   : > { %v924_v50 = vpop.xlane.xlu0 %923  ;;  %v912_v51 = vpop.xlane.xlu1 %911 }
 0x34e   : > { %v925_v4 = vrot.slane %v924_v50, 4  ;;  %v913_v52 = vrot.slane %v912_v51, 4 }
 0x350   : > { %v926_v53 = vadd.f32 %v925_v4, %v924_v50  ;;  %v914_v54 = vadd.f32 %v913_v52, %v912_v51 }
 0x352   : > { %v927_v55 = vrot.slane %v926_v53, 2  ;;  %v915_v56 = vrot.slane %v914_v54, 2 }
 0x354   : > { %v928_v57 = vadd.f32 %v927_v55, %v926_v53  ;;  %v916_v58 = vadd.f32 %v915_v56, %v914_v54 }
 0x356   : > { %v917_v60 = vrot.slane %v916_v58, 1  ;;  %v929_v61 = vrot.slane %v928_v57, 1 }
 0x358   : > { %v918_v62 = vadd.f32 %v917_v60, %v916_v58  ;;  %v930_v10 = vadd.f32 %v929_v61, %v928_v57 }
 0x35a   : > { %1045 = vpush %v918_v62 }
 0x35b   : > { %1047 = vpush %v930_v10 }
 0x38b   : > { %s1046_s7 = spop %1045 }
 0x38c   : > { %v936_v63 = vstv %s1046_s7  ;;  %s1048_s8 = spop %1047 }
 0x38d   : > { %v934_v1 = vstv %s1048_s8 }
 0x38e   : > { %v935_v2 = vsel %vm933_vm4, %v934_v1, 0.0 }
 0x38f   : > { %v937_v3 = vsel %vm932_vm5, %v936_v63, %v935_v2 }
 0x390   : > { %938 = vst [vmem:[%s244_s11] sm:$0xff] %v937_v3 }
 0x391 PF: > { %p13_p9 = scmp.ge.s32.totalorder %s1249_s17, 4   ;;  %s1504_s12 = smov %s1191_s13 }
 0x392   : > { %s1505_s13 = smov %s1195_s14  ;;  %s1506_s14 = smov %s1259_s20 }
 0x393   : > { %s1507_s15 = smov %s1249_s17  ;;  %15 = sbr.rel (!%p13_p9) target bundleno = 3 (0x3), region = 78 }
 0x39a   :  { %958 = vsyncpa [#allocation3], 1 }
 0x39b   :  { %960 = vsyncpa [#allocation3 + $0x1], 1 }

</bundles_post_ra>
